<compile_context>
chip_gen: v7x
topology: tpu7x:2x2x1
jax: 0.10.0
libtpu: 0.0.40
codegen_flags: <defaults>
</compile_context>

<pallas_src>
import functools

import jax
import jax.numpy as jnp
from jax import lax
from jax.experimental import pallas as pl
from jax.experimental.pallas import tpu as pltpu


def _round_up(x, m):
    return ((x + m - 1) // m) * m


def _surrogate_precision_kernel(xq_ref, xall_ref, sqn_all_ref, lcol_ref,
                                lrow_ref, out_ref, dist2_ref, dist3_ref, *,
                                bs, si, n_slabs, k_eff, inv_2t1, inv_2t2,
                                k_norm):
    gi = pl.program_id(1)
    tq, bs_p = dist2_ref.shape
    n_g, _, cg = dist3_ref.shape

    # First gallery chunk for this query tile: cache the scaled distances to
    # the whole (padded) batch, both as a flat [tq, bs_p] slab (for static
    # i-axis slabs) and chunked [n_g, tq, cg] (for dynamic per-chunk reads),
    # and zero the resident precision accumulator (out_ref).
    @pl.when(gi == 0)
    def _init():
        xq = xq_ref[...]                                       # [tq, d]
        sq_q = jnp.sum(xq * xq, axis=-1, keepdims=True)        # [tq, 1]
        gram = lax.dot_general(
            xq, xall_ref[...],
            dimension_numbers=(((1,), (1,)), ((), ())),
            preferred_element_type=jnp.float32)                # [tq, bs_p]
        d2 = sq_q + sqn_all_ref[...] - 2.0 * gram
        dscaled = jnp.sqrt(jnp.maximum(d2, 0.0)) * inv_2t2     # D/(2*t2)
        dist2_ref[...] = dscaled
        for j in range(n_g):
            dist3_ref[j] = dscaled[:, j * cg:(j + 1) * cg]
        out_ref[...] = jnp.zeros_like(out_ref)

    dg = dist3_ref[gi]                                         # [tq, cg]

    # Soft rank:
    #   rank[q,g] = sum_{i valid} sigmoid((D[q,g]-D[q,i])/t2)
    #             = 0.5*bs + 0.5*sum_{i} tanh(z) * valid[i]
    # The cube carries only {subtract, tanh}; the masked i-sum runs on the
    # MXU (batched dot_general against the 0/1 validity vector).
    ssum = None
    for s in range(n_slabs):
        c0 = s * si
        dall = dist2_ref[:, c0:c0 + si]                        # [tq, si]
        z = dg[:, :, None] - dall[:, None, :]                  # [tq, cg, si]
        t = jnp.tanh(z)                                        # EUP
        vrow = (lax.broadcasted_iota(jnp.int32, (1, 1, si), 2)
                < (bs - c0)).astype(jnp.float32)
        vb = jnp.broadcast_to(vrow, (tq, 1, si))
        part = lax.dot_general(                                # [tq, cg, 1]
            t, vb,
            dimension_numbers=(((2,), (2,)), ((0,), (0,))),
            preferred_element_type=jnp.float32)
        ssum = part if ssum is None else ssum + part
    rank = 0.5 * (float(bs) + jnp.sum(ssum, axis=2))           # [tq, cg]

    # Ground-truth mask for this gallery chunk (padded columns masked out).
    valid_g = (lax.broadcasted_iota(jnp.int32, (1, cg), 1) + gi * cg
               < bs).astype(jnp.float32)
    mask_gt = jnp.where(lcol_ref[...] == lrow_ref[...], 1.0, 0.0) * valid_g

    prec = (0.5 + 0.5 * jnp.tanh((k_eff - rank) * inv_2t1)) * mask_gt
    out_ref[...] += jnp.sum(prec, axis=1, keepdims=True)       # [tq, 1]

    @pl.when(gi == pl.num_programs(1) - 1)
    def _fin():
        out_ref[...] = out_ref[...] * k_norm


def surrogate_precision_loss(features, labels, *, k, temperature1=1.0,
                             temperature2=0.01, reduction="mean"):
    """Pallas TPU implementation of SurrogatePrecision.forward."""
    assert k > 0
    assert reduction in ("mean", "sum", "none")
    bs, d = features.shape
    k_eff = float(k + 1)  # self-copy sits at rank 1 with zero distance

    # ---- generation-aware VMEM budgets ------------------------------------
    try:
        vmem_cap = int(pltpu.get_tpu_info().vmem_capacity_bytes)
    except Exception:  # conservative (v7x-like) fallback
        vmem_cap = 64 * 1024 * 1024
    vmem_limit = min(3 * vmem_cap // 4, 96 * 1024 * 1024)
    cube_budget_elems = (vmem_cap // 8) // 4   # f32 elems for one live cube

    # ---- tile sizes & padding ---------------------------------------------
    if bs <= 128:
        bs_p = _round_up(max(bs, 8), 8)
        cg = bs_p
        # Split the query axis in two when possible so both v7x TCs get work.
        tq = bs_p // 2 if bs_p % 16 == 0 else bs_p
        si, n_slabs = bs_p, 1
    else:
        bs_p = _round_up(bs, 128)
        cg = 128
        tq = 128
        while tq > 8 and tq * cg * bs_p > cube_budget_elems:
            tq //= 2
        # If tq bottomed out, process the i-axis (columns of the distance
        # cache) in static slabs so the live cube stays within budget.
        m = bs_p // cg
        n_slabs = m
        for cand in range(1, m + 1):
            if m % cand == 0 and tq * cg * (bs_p // cand) <= cube_budget_elems:
                n_slabs = cand
                break
        si = bs_p // n_slabs
    n_q = bs_p // tq
    n_g = bs_p // cg

    x = jnp.pad(features.astype(jnp.float32), ((0, bs_p - bs), (0, 0)))
    lab = jnp.pad(labels.astype(jnp.int32).reshape(-1), (0, bs_p - bs))
    lab_col = lab.reshape(bs_p, 1)
    lab_row = lab.reshape(1, bs_p)
    sqn_row = jnp.sum(x * x, axis=1).reshape(1, bs_p)

    kernel = functools.partial(
        _surrogate_precision_kernel,
        bs=bs, si=si, n_slabs=n_slabs,
        k_eff=k_eff,
        inv_2t1=0.5 / float(temperature1),
        inv_2t2=0.5 / float(temperature2),
        k_norm=1.0 / k_eff)

    grid_spec = pltpu.PrefetchScalarGridSpec(
        num_scalar_prefetch=0,
        grid=(n_q, n_g),
        in_specs=[
            pl.BlockSpec((tq, d), lambda qi, gi: (qi, 0)),    # query rows
            pl.BlockSpec((bs_p, d), lambda qi, gi: (0, 0)),   # all rows
            pl.BlockSpec((1, bs_p), lambda qi, gi: (0, 0)),   # sq-norms (all)
            pl.BlockSpec((tq, 1), lambda qi, gi: (qi, 0)),    # labels column
            pl.BlockSpec((1, cg), lambda qi, gi: (0, gi)),    # labels row chunk
        ],
        out_specs=pl.BlockSpec((tq, 1), lambda qi, gi: (qi, 0)),
        scratch_shapes=[
            pltpu.VMEM((tq, bs_p), jnp.float32),     # scaled dist, flat
            pltpu.VMEM((n_g, tq, cg), jnp.float32),  # scaled dist, chunked
        ])

    cost = pl.CostEstimate(
        flops=int(2 * bs_p * bs_p * d + 4 * bs_p ** 3),
        transcendentals=int(bs_p ** 3 + 2 * bs_p ** 2),
        bytes_accessed=int(4 * ((n_q + 2) * bs_p * d + 6 * bs_p)))

    prec_col = pl.pallas_call(
        kernel,
        out_shape=jax.ShapeDtypeStruct((bs_p, 1), jnp.float32),
        grid_spec=grid_spec,
        compiler_params=pltpu.CompilerParams(
            dimension_semantics=("parallel", "arbitrary"),
            vmem_limit_bytes=vmem_limit),
        cost_estimate=cost,
    )(x, x, sqn_row, lab_col, lab_row)

    prec = prec_col[:bs, 0]
    if reduction == "mean":
        return 1.0 - jnp.mean(prec)
    if reduction == "sum":
        return 1.0 - jnp.sum(prec)
    return 1.0 - prec


def _reference(features, labels, *, k, t1=1.0, t2=0.01, reduction="mean"):
    """Pure-JAX reference mirroring the PyTorch/OML code path."""
    k_eff = float(k + 1)
    x = features.astype(jnp.float32)
    d2 = jnp.sum((x[:, None, :] - x[None, :, :]) ** 2, axis=-1)
    dist = jnp.sqrt(jnp.maximum(d2, 0.0))
    mask = (labels[:, None] == labels[None, :]).astype(jnp.float32)
    diff = dist[:, :, None] - dist[:, None, :]
    rank = jnp.sum(jax.nn.sigmoid(diff / t2), axis=2)
    prec = jnp.sum(jax.nn.sigmoid((k_eff - rank) / t1) * mask, axis=1) / k_eff
    if reduction == "mean":
        prec = jnp.mean(prec)
    elif reduction == "sum":
        prec = jnp.sum(prec)
    return 1.0 - prec


if __name__ == "__main__":
    key = jax.random.PRNGKey(0)
    kf, kl, kf2, kl2, kf3, kl3 = jax.random.split(key, 6)

    # Case 1: small batch, "mean" reduction (single query tile).
    bs, feat_dim, topk = 8, 32, 3
    features = jax.random.normal(kf, (bs, feat_dim), dtype=jnp.float32)
    labels = jax.random.randint(kl, (bs,), 0, 3, dtype=jnp.int32)
    loss = surrogate_precision_loss(features, labels, k=topk,
                                    temperature1=1.0, temperature2=0.01,
                                    reduction="mean")
    loss = jax.block_until_ready(loss)
    ref = _reference(features, labels, k=topk, t1=1.0, t2=0.01,
                     reduction="mean")
    assert jnp.allclose(loss, ref, rtol=1e-4, atol=1e-4), (loss, ref)

    # Case 2: batch not a multiple of 8 (padding/masking, split query axis),
    # "none" reduction.
    bs2 = 12
    features2 = jax.random.normal(kf2, (bs2, feat_dim), dtype=jnp.float32)
    labels2 = jax.random.randint(kl2, (bs2,), 0, 4, dtype=jnp.int32)
    loss2 = surrogate_precision_loss(features2, labels2, k=topk,
                                     reduction="none")
    loss2 = jax.block_until_ready(loss2)
    ref2 = _reference(features2, labels2, k=topk, reduction="none")
    assert jnp.allclose(loss2, ref2, rtol=1e-4, atol=1e-4), (loss2, ref2)

    # Case 3: bs > 128 exercises the large-batch path (multiple gallery
    # chunks, dynamic per-chunk distance reads, padding to 256).
    bs3, d3 = 130, 16
    features3 = jax.random.normal(kf3, (bs3, d3), dtype=jnp.float32)
    labels3 = jax.random.randint(kl3, (bs3,), 0, 6, dtype=jnp.int32)
    loss3 = surrogate_precision_loss(features3, labels3, k=topk,
                                     reduction="mean")
    loss3 = jax.block_until_ready(loss3)
    ref3 = _reference(features3, labels3, k=topk, reduction="mean")
    assert jnp.allclose(loss3, ref3, rtol=2e-3, atol=2e-3), (loss3, ref3)

    print("KERNEL_OK")
</pallas_src>

<mosaic_0001>
module attributes {stable_mosaic.version = 11 : i64} {
  func.func @_surrogate_precision_kernel(%arg0: i32, %arg1: i32, %arg2: memref<8x32xf32, #tpu.memory_space<vmem>>, %arg3: memref<8x32xf32, #tpu.memory_space<vmem>>, %arg4: memref<1x8xf32, #tpu.memory_space<vmem>>, %arg5: memref<8x1xi32, #tpu.memory_space<vmem>>, %arg6: memref<1x8xi32, #tpu.memory_space<vmem>>, %arg7: memref<8x1xf32, #tpu.memory_space<vmem>>, %arg8: memref<8x8xf32, #tpu.memory_space<vmem>>, %arg9: memref<1x8x8xf32, #tpu.memory_space<vmem>>) attributes {dimension_semantics = [#tpu.dimension_semantics<parallel>, #tpu.dimension_semantics<arbitrary>], iteration_bounds = array<i64: 1, 1>, scalar_prefetch = 0 : i64, scratch_operands = 2 : i64, tpu.core_type = #tpu.core_type<tc>, window_params = [{transform_indices = @transform_0, window_bounds = array<i64: 8, 32>}, {pipeline_mode = #tpu.pipeline_mode<synchronous>, transform_indices = @transform_1, window_bounds = array<i64: 8, 32>}, {pipeline_mode = #tpu.pipeline_mode<synchronous>, transform_indices = @transform_2, window_bounds = array<i64: 1, 8>}, {transform_indices = @transform_3, window_bounds = array<i64: 8, 1>}, {transform_indices = @transform_4, window_bounds = array<i64: 1, 8>}, {transform_indices = @transform_5, window_bounds = array<i64: 8, 1>}]} {
    %c0_i32 = arith.constant 0 : i32
    %0 = arith.cmpi eq, %arg1, %c0_i32 : i32
    %1 = arith.extui %0 : i1 to i32
    %c0_i32_0 = arith.constant 0 : i32
    %2 = arith.cmpi ne, %1, %c0_i32_0 : i32
    scf.if %2 {
      %c0_26 = arith.constant 0 : index
      %c0_27 = arith.constant 0 : index
      %62 = vector.load %arg2[%c0_26, %c0_27] : memref<8x32xf32, #tpu.memory_space<vmem>>, vector<8x32xf32>
      %63 = arith.mulf %62, %62 : vector<8x32xf32>
      %cst_28 = arith.constant dense<0.000000e+00> : vector<8xf32>
      %64 = vector.multi_reduction <add>, %63, %cst_28 [1] : vector<8x32xf32> to vector<8xf32>
      %65 = vector.shape_cast %64 : vector<8xf32> to vector<8x1xf32>
      %c0_29 = arith.constant 0 : index
      %c0_30 = arith.constant 0 : index
      %66 = vector.load %arg3[%c0_29, %c0_30] : memref<8x32xf32, #tpu.memory_space<vmem>>, vector<8x32xf32>
      %cst_31 = arith.constant dense<0.000000e+00> : vector<8x8xf32>
      %67 = tpu.matmul %62, %66, %cst_31 {dimension_numbers = #tpu.dot_dimension_numbers<[1], [1], [0], [0], [0, 0, 1, 0], [], []>} : vector<8x32xf32>, vector<8x32xf32>, vector<8x8xf32> -> vector<8x8xf32>
      %c0_32 = arith.constant 0 : index
      %c0_33 = arith.constant 0 : index
      %68 = vector.load %arg4[%c0_32, %c0_33] : memref<1x8xf32, #tpu.memory_space<vmem>>, vector<1x8xf32>
      %69 = vector.broadcast %65 : vector<8x1xf32> to vector<8x8xf32>
      %70 = vector.broadcast %68 : vector<1x8xf32> to vector<8x8xf32>
      %71 = arith.addf %69, %70 : vector<8x8xf32>
      %cst_34 = arith.constant 2.000000e+00 : f32
      %72 = vector.broadcast %cst_34 : f32 to vector<8x8xf32>
      %73 = arith.mulf %72, %67 : vector<8x8xf32>
      %74 = arith.subf %71, %73 : vector<8x8xf32>
      %cst_35 = arith.constant 0.000000e+00 : f32
      %75 = vector.broadcast %cst_35 : f32 to vector<8x8xf32>
      %76 = arith.maximumf %74, %75 : vector<8x8xf32>
      %77 = math.sqrt %76 : vector<8x8xf32>
      %cst_36 = arith.constant 5.000000e+01 : f32
      %78 = vector.broadcast %cst_36 : f32 to vector<8x8xf32>
      %79 = arith.mulf %77, %78 : vector<8x8xf32>
      %c0_37 = arith.constant 0 : index
      %c0_38 = arith.constant 0 : index
      %80 = vector.load %arg8[%c0_37, %c0_38] : memref<8x8xf32, #tpu.memory_space<vmem>>, vector<8x8xf32>
      tpu.vector_store %arg8[%c0_37, %c0_38], %79 {strides = array<i32>} : memref<8x8xf32, #tpu.memory_space<vmem>>, vector<8x8xf32>,
      %c0_39 = arith.constant 0 : index
      %c0_40 = arith.constant 0 : index
      %c0_41 = arith.constant 0 : index
      %81 = vector.load %arg9[%c0_39, %c0_40, %c0_41] : memref<1x8x8xf32, #tpu.memory_space<vmem>>, vector<1x8x8xf32>
      %82 = vector.shape_cast %81 : vector<1x8x8xf32> to vector<8x8xf32>
      %83 = vector.shape_cast %79 : vector<8x8xf32> to vector<1x8x8xf32>
      tpu.vector_store %arg9[%c0_39, %c0_40, %c0_41], %83 {strides = array<i32>} : memref<1x8x8xf32, #tpu.memory_space<vmem>>, vector<1x8x8xf32>,
      %cst_42 = arith.constant 0.000000e+00 : f32
      %84 = vector.broadcast %cst_42 : f32 to vector<8x1xf32>
      %c0_43 = arith.constant 0 : index
      %c0_44 = arith.constant 0 : index
      %85 = vector.load %arg7[%c0_43, %c0_44] : memref<8x1xf32, #tpu.memory_space<vmem>>, vector<8x1xf32>
      tpu.vector_store %arg7[%c0_43, %c0_44], %84 {strides = array<i32>} : memref<8x1xf32, #tpu.memory_space<vmem>>, vector<8x1xf32>,
    } else {
    }
    %3 = arith.index_cast %arg1 : i32 to index
    %c0 = arith.constant 0 : index
    %c0_1 = arith.constant 0 : index
    %4 = vector.load %arg9[%3, %c0, %c0_1] : memref<1x8x8xf32, #tpu.memory_space<vmem>>, vector<1x8x8xf32>
    %5 = vector.shape_cast %4 : vector<1x8x8xf32> to vector<8x8xf32>
    %c0_2 = arith.constant 0 : index
    %c0_3 = arith.constant 0 : index
    %6 = vector.load %arg8[%c0_2, %c0_3] : memref<8x8xf32, #tpu.memory_space<vmem>>, vector<8x8xf32>
    %7 = vector.shape_cast %5 : vector<8x8xf32> to vector<8x8x1xf32>
    %8 = vector.shape_cast %6 : vector<8x8xf32> to vector<8x1x8xf32>
    %9 = vector.broadcast %7 : vector<8x8x1xf32> to vector<8x8x8xf32>
    %10 = vector.broadcast %8 : vector<8x1x8xf32> to vector<8x8x8xf32>
    %11 = arith.subf %9, %10 : vector<8x8x8xf32>
    %12 = math.tanh %11 : vector<8x8x8xf32>
    %13 = tpu.iota {dimensions = array<i32: 2>} : vector<1x1x8xi32>
    %c8_i32 = arith.constant 8 : i32
    %14 = vector.broadcast %c8_i32 : i32 to vector<1x1x8xi32>
    %15 = arith.cmpi slt, %13, %14 : vector<1x1x8xi32>
    %16 = arith.extui %15 : vector<1x1x8xi1> to vector<1x1x8xi32>
    %17 = arith.sitofp %16 : vector<1x1x8xi32> to vector<1x1x8xf32>
    %18 = vector.shape_cast %17 : vector<1x1x8xf32> to vector<1x1x8xf32>
    %19 = vector.broadcast %18 : vector<1x1x8xf32> to vector<8x1x8xf32>
    %cst = arith.constant dense<0.000000e+00> : vector<8x8x1xf32>
    %20 = tpu.matmul %12, %19, %cst {dimension_numbers = #tpu.dot_dimension_numbers<[2], [2], [1], [1], [0, 0, 0, 1, 1, 1], [0], [0]>} : vector<8x8x8xf32>, vector<8x1x8xf32>, vector<8x8x1xf32> -> vector<8x8x1xf32>
    %cst_4 = arith.constant dense<0.000000e+00> : vector<8x8xf32>
    %21 = vector.multi_reduction <add>, %20, %cst_4 [2] : vector<8x8x1xf32> to vector<8x8xf32>
    %cst_5 = arith.constant 8.000000e+00 : f32
    %22 = vector.broadcast %cst_5 : f32 to vector<8x8xf32>
    %23 = arith.addf %22, %21 : vector<8x8xf32>
    %cst_6 = arith.constant 5.000000e-01 : f32
    %24 = vector.broadcast %cst_6 : f32 to vector<8x8xf32>
    %25 = arith.mulf %24, %23 : vector<8x8xf32>
    %26 = tpu.iota {dimensions = array<i32: 1>} : vector<1x8xi32>
    %c8_i32_7 = arith.constant 8 : i32
    %27 = arith.muli %arg1, %c8_i32_7 : i32
    %28 = vector.broadcast %27 : i32 to vector<1x8xi32>
    %29 = arith.addi %26, %28 : vector<1x8xi32>
    %c8_i32_8 = arith.constant 8 : i32
    %30 = vector.broadcast %c8_i32_8 : i32 to vector<1x8xi32>
    %31 = arith.cmpi slt, %29, %30 : vector<1x8xi32>
    %32 = arith.extui %31 : vector<1x8xi1> to vector<1x8xi32>
    %33 = arith.sitofp %32 : vector<1x8xi32> to vector<1x8xf32>
    %c0_9 = arith.constant 0 : index
    %c0_10 = arith.constant 0 : index
    %34 = vector.load %arg5[%c0_9, %c0_10] : memref<8x1xi32, #tpu.memory_space<vmem>>, vector<8x1xi32>
    %c0_11 = arith.constant 0 : index
    %c0_12 = arith.constant 0 : index
    %35 = vector.load %arg6[%c0_11, %c0_12] : memref<1x8xi32, #tpu.memory_space<vmem>>, vector<1x8xi32>
    %36 = vector.broadcast %34 : vector<8x1xi32> to vector<8x8xi32>
    %37 = vector.broadcast %35 : vector<1x8xi32> to vector<8x8xi32>
    %38 = arith.cmpi eq, %36, %37 : vector<8x8xi32>
    %cst_13 = arith.constant 1.000000e+00 : f32
    %cst_14 = arith.constant 0.000000e+00 : f32
    %39 = vector.broadcast %cst_13 : f32 to vector<8x8xf32>
    %40 = vector.broadcast %cst_14 : f32 to vector<8x8xf32>
    %41 = arith.select %38, %39, %40 : vector<8x8xi1>, vector<8x8xf32>
    %42 = vector.broadcast %33 : vector<1x8xf32> to vector<8x8xf32>
    %43 = arith.mulf %41, %42 : vector<8x8xf32>
    %cst_15 = arith.constant 4.000000e+00 : f32
    %44 = vector.broadcast %cst_15 : f32 to vector<8x8xf32>
    %45 = arith.subf %44, %25 : vector<8x8xf32>
    %cst_16 = arith.constant 5.000000e-01 : f32
    %46 = vector.broadcast %cst_16 : f32 to vector<8x8xf32>
    %47 = arith.mulf %45, %46 : vector<8x8xf32>
    %48 = math.tanh %47 : vector<8x8xf32>
    %cst_17 = arith.constant 5.000000e-01 : f32
    %49 = vector.broadcast %cst_17 : f32 to vector<8x8xf32>
    %50 = arith.mulf %49, %48 : vector<8x8xf32>
    %cst_18 = arith.constant 5.000000e-01 : f32
    %51 = vector.broadcast %cst_18 : f32 to vector<8x8xf32>
    %52 = arith.addf %51, %50 : vector<8x8xf32>
    %53 = arith.mulf %52, %43 : vector<8x8xf32>
    %c0_19 = arith.constant 0 : index
    %c0_20 = arith.constant 0 : index
    %54 = vector.load %arg7[%c0_19, %c0_20] : memref<8x1xf32, #tpu.memory_space<vmem>>, vector<8x1xf32>
    %cst_21 = arith.constant dense<0.000000e+00> : vector<8xf32>
    %55 = vector.multi_reduction <add>, %53, %cst_21 [1] : vector<8x8xf32> to vector<8xf32>
    %56 = vector.shape_cast %55 : vector<8xf32> to vector<8x1xf32>
    %57 = arith.addf %54, %56 : vector<8x1xf32>
    %c0_22 = arith.constant 0 : index
    %c0_23 = arith.constant 0 : index
    %58 = vector.load %arg7[%c0_22, %c0_23] : memref<8x1xf32, #tpu.memory_space<vmem>>, vector<8x1xf32>
    tpu.vector_store %arg7[%c0_22, %c0_23], %57 {strides = array<i32>} : memref<8x1xf32, #tpu.memory_space<vmem>>, vector<8x1xf32>,
    %c0_i32_24 = arith.constant 0 : i32
    %59 = arith.cmpi eq, %arg1, %c0_i32_24 : i32
    %60 = arith.extui %59 : i1 to i32
    %c0_i32_25 = arith.constant 0 : i32
    %61 = arith.cmpi ne, %60, %c0_i32_25 : i32
    scf.if %61 {
      %c0_26 = arith.constant 0 : index
      %c0_27 = arith.constant 0 : index
      %62 = vector.load %arg7[%c0_26, %c0_27] : memref<8x1xf32, #tpu.memory_space<vmem>>, vector<8x1xf32>
      %cst_28 = arith.constant 2.500000e-01 : f32
      %63 = vector.broadcast %cst_28 : f32 to vector<8x1xf32>
      %64 = arith.mulf %62, %63 : vector<8x1xf32>
      %c0_29 = arith.constant 0 : index
      %c0_30 = arith.constant 0 : index
      %65 = vector.load %arg7[%c0_29, %c0_30] : memref<8x1xf32, #tpu.memory_space<vmem>>, vector<8x1xf32>
      tpu.vector_store %arg7[%c0_29, %c0_30], %64 {strides = array<i32>} : memref<8x1xf32, #tpu.memory_space<vmem>>, vector<8x1xf32>,
    } else {
    }
    return
  }
  func.func @transform_0(%arg0: i32, %arg1: i32) -> (i32, i32) {
    %c0_i32 = arith.constant 0 : i32
    %c0_i32_0 = arith.constant 0 : i32
    return %arg0, %c0_i32 : i32, i32
  }
  func.func @transform_1(%arg0: i32, %arg1: i32) -> (i32, i32) {
    %c0_i32 = arith.constant 0 : i32
    %c0_i32_0 = arith.constant 0 : i32
    %c0_i32_1 = arith.constant 0 : i32
    return %c0_i32, %c0_i32_0 : i32, i32
  }
  func.func @transform_2(%arg0: i32, %arg1: i32) -> (i32, i32) {
    %c0_i32 = arith.constant 0 : i32
    %c0_i32_0 = arith.constant 0 : i32
    %c0_i32_1 = arith.constant 0 : i32
    return %c0_i32, %c0_i32_0 : i32, i32
  }
  func.func @transform_3(%arg0: i32, %arg1: i32) -> (i32, i32) {
    %c0_i32 = arith.constant 0 : i32
    %c0_i32_0 = arith.constant 0 : i32
    return %arg0, %c0_i32 : i32, i32
  }
  func.func @transform_4(%arg0: i32, %arg1: i32) -> (i32, i32) {
    %c0_i32 = arith.constant 0 : i32
    %c0_i32_0 = arith.constant 0 : i32
    return %c0_i32, %arg1 : i32, i32
  }
  func.func @transform_5(%arg0: i32, %arg1: i32) -> (i32, i32) {
    %c0_i32 = arith.constant 0 : i32
    %c0_i32_0 = arith.constant 0 : i32
    return %arg0, %c0_i32 : i32, i32
  }
}

</mosaic_0001>

<bundles_post_ra>
// kernel: tpu_custom_call.1
= control target key start
LH: loop header
LB: loop body
LE: loop exit
PB: predicated region body
PF: predicated region fallthrough
CT: control target
= control target key end

     0   :  { %10 = vsyncpa [#allocation5], 0  ;;  %s677_s18 = smov [#allocation4]   ;;  %s847_s0 = inlined_call_operand.vmem [shape: f32[8,32], index: 0, kind: input, shape index: {}]   ;;  %s848_s1 = inlined_call_operand.hbm [shape: f32[8,32], index: 1, kind: input, shape index: {}]   ;;  %s849_s2 = inlined_call_operand.vmem [shape: f32[1,8], index: 2, kind: input, shape index: {}]   ;;  %s850_s3 = inlined_call_operand.vmem [shape: s32[8,1], index: 3, kind: input, shape index: {}]   ;;  %s851_s4 = inlined_call_operand.vmem [shape: s32[1,8], index: 4, kind: input, shape index: {}]   ;;  %s852_s5 = inlined_call_operand.vmem [shape: f32[8,1], index: 5, kind: output, shape index: {}]  }
   0x1   :  { %s19_s19 = sshll.u32 %s677_s18, 4  ;;  %s653_s22 = scalar_lea.hbm %s848_s1, 128  ;;  %s20_s19 = int_to_ptr.vmem [resolvable:$true] %s19_s19 }
   0x2   :  { %p654_p0 = scmp.ne.s32.totalorder %s848_s1, %s653_s22  ;;  %p657_p1 = scmp.lt.u32.totalorder %s653_s22, %s848_s1 }
   0x4   :  { %p659_p2 = pnand %p657_p1, %p654_p0 }
   0x6   :  { %662 = shalt.err (!%p659_p2)
}
   0x7   :  { %s663_s27 = scalar_lea.vmem %s20_s19, 128  ;;  %p668_p4 = scmp.lt.s32.totalorder %s20_s19, %s20_s19 }
   0x8   :  { %p664_p3 = scmp.ne.s32.totalorder %s20_s19, %s663_s27  ;;  %p669_p5 = scmp.lt.s32.totalorder %s663_s27, %s663_s27 }
   0xa   :  { %p670_p6 = por %p669_p5, %p668_p4 }
   0xc   :  { %p671_p7 = pnand %p670_p6, %p664_p3 }
   0xe   :  { %674 = shalt.err (!%p671_p7)
}
   0xf   :  { %22 = dma.hbm_to_vmem [thread:$0]  %s848_s1, 128, %s20_s19, [#allocation5]  }
  0x10   :  { %675 = dma.done.wait [#allocation5], 128  }
  0x11   :  { %676 = vsyncadd [#allocation5], 4294967168  ;;  %vm141_vm0 = vcmask 7168   ;;  %v678_v0 = vmov 0.0   ;;  %vm679_vm1 = vmmov 0   ;;  %vm38_vm2 = vcmask 261120  }
  0x12   :  { %606 = vmatprep.subr.mxu0 %v678_v0  ;;  %142 = vst.msk [vmem:[%s852_s5] sm:$0xff] %vm141_vm0, %v678_v0  ;;  %608 = vmatprep.mubr.msk.f32.mxu0 %vm679_vm1, %v678_v0  ;;  %v42_v1 = vld [vmem:[#allocation4] sm:$0xff]  ;;  %v36_v2 = vld [vmem:[%s847_s0] sm:$0xff]  ;;  %v680_v5 = vmov 0   ;;  %v147_v17 = vlaneseq  ;;  %vm138_vm5 = vcmask 64512   ;;  %vm566_vm8 = vcmask 1041409  }
  0x13   :  { %607 = vmatpush3.xpose.msk.msra.mxu0 %vm38_vm2, %v42_v1  ;;  %v37_v3 = vmul.f32 %v36_v2, %v36_v2  ;;  %616 = vset.pattern.permute.xlu0 %v680_v5  ;;  %v600_v6 = vld [vmem:[%s849_s2] ss:$0 sm:$0xff]  ;;  %v681_v40 = vmov 1966171168   ;;  %vm568_vm9 = vcmask 1042434   ;;  %vm570_vm10 = vcmask 1043459  }
  0x14   :  { %617 = vset.pattern.permute.xlu1 %v680_v5  ;;  %v737_v21 = vshrl.u32 %v147_v17, 7  ;;  %v376_v28 = vld [vmem:[%s850_s3] sm:$0xff]  ;;  %v206_v41 = vunpack.c.l.s4 %v681_v40  ;;  %v771_v54 = vand.u32 127, %v147_v17  ;;  %vm572_vm11 = vcmask 1044484  }
  0x15   :  { %v39_v4 = vsel %vm38_vm2, %v37_v3, 0.0  ;;  %vm574_vm12 = vcmask 1045509   ;;  %vm576_vm13 = vcmask 1046534   ;;  %vm578_vm14 = vcmask 1047559  }
  0x16   :  { %609 = vmatmul.mubr.msk.f32.vlgmr.msra.gmra.mrb[0].mxu0 %vm38_vm2, %v36_v2  ;;  %40 = vadd.xlane.f32.xlu0 %v39_v4  ;;  %v156_v22 = vsub.s32 1, %v737_v21  ;;  %v743_v23 = vsub.s32 0, %v737_v21  ;;  %v163_v27 = vsub.s32 2, %v737_v21  ;;  %v170_v30 = vsub.s32 3, %v737_v21  ;;  %v603_v4 = vld [vmem:[%s851_s4] ss:$0 sm:$0xff] }
  0x17   :  { %v177_v32 = vsub.s32 4, %v737_v21  ;;  %v184_v34 = vsub.s32 5, %v737_v21  ;;  %v191_v36 = vsub.s32 6, %v737_v21  ;;  %v198_v38 = vsub.s32 7, %v737_v21 }
  0x18   :  { %v207_v42 = vunpack.c.0.s8 %v206_v41  ;;  %vm311_vm6 = vcmp.lt.s32.totalorder %v771_v54, 8 }
  0x19   :  { %v776_v60 = vsel %vm311_vm6, 1.0, %v678_v0 }
  0x1a   :  { %v210_v43 = vsub.s32 %v207_v42, %v737_v21 }
  0xa3   :  { %v41_v7 = vpop.xlane.xlu0 %40 }
  0xa4   :  { %v126_v8 = vadd.f32 %v600_v6, %v41_v7 }
  0xe9   :  { %v115_v9 = vpop.f32.mrb[0].mxu0 }
  0xea   :  { %v127_v10 = vmul.f32 2.0, %v115_v9  ;;  %v610_v11 = vpop.f32.mrb[1].mxu0 }
  0xec   :  { %v128_v12 = vsub.f32 %v126_v8, %v127_v10 }
  0xee   :  { %v129_v13 = vmax.f32 %v128_v12, 0.0 }
  0xf0   :  { %619 = vrsqrt.f32 %v129_v13  ;;  %vm132_vm3 = vcmp.eq.f32.partialorder %v129_v13, inf  ;;  %v135_v16 = vand.u32 2147483648, %v129_v13  ;;  %vm134_vm4 = vcmp.eq.f32.partialorder %v129_v13, 0.0 }
  0xfa   :  { %v620_v14 = vpop.eup %619 }
  0xfb   :  { %v131_v15 = vmul.f32 %v620_v14, %v129_v13 }
  0xfd   :  { %v133_v18 = vsel %vm132_vm3, %v129_v13, %v131_v15 }
  0xfe   :  { %v136_v19 = vsel %vm134_vm4, %v135_v16, %v133_v18 }
  0xff   :  { %v137_v20 = vmul.f32 50.0, %v136_v19 }
 0x101   :  { %139 = vst.msk [vmem:[#allocation2] sm:$0xff] %vm138_vm5, %v137_v20  ;;  %140 = vst.msk [vmem:[#allocation3] sm:$0xff] %vm138_vm5, %v137_v20 }
 0x108   :  { %v145_v24 = vld [vmem:[#allocation3] sm:$0xff]  ;;  %v146_v44 = vld [vmem:[#allocation2] sm:$0xff] }
 0x109   :  { %v157_v25 = vrot.slane %v145_v24, %v156_v22  ;;  %v150_v26 = vrot.slane %v145_v24, %v743_v23  ;;  %v164_v29 = vrot.slane %v145_v24, %v163_v27  ;;  %v171_v31 = vrot.slane %v145_v24, %v170_v30 }
 0x10a   :  { %v178_v33 = vrot.slane %v145_v24, %v177_v32  ;;  %v185_v35 = vrot.slane %v145_v24, %v184_v34  ;;  %v192_v37 = vrot.slane %v145_v24, %v191_v36  ;;  %v199_v39 = vrot.slane %v145_v24, %v198_v38 }
 0x10b   :  { %159 = vbcast.lane.b32.xlu1 %v157_v25, 256  ;;  %152 = vbcast.lane.b32.xlu0 %v150_v26, 256  ;;  %v211_v45 = vrot.slane %v146_v44, %v210_v43  ;;  %v204_v49 = vcombine.high %v146_v44, %v146_v44 }
 0x10d   :  { %v219_v46 = vcombine.high %v211_v45, %v211_v45  ;;  %v218_v53 = vrot.slane %v204_v49, %v210_v43  ;;  %v227_v24 = vrot.slane %v211_v45, %v210_v43 }
 0x10f   :  { %166 = vbcast.lane.b32.xlu1 %v164_v29, 256  ;;  %379 = vperm.xlu0 %616, %v376_v28   ;;  %v241_v47 = vrot.slane %v219_v46, %v210_v43  ;;  %v220_v57 = vcombine.high %v218_v53, %v218_v53  ;;  %v256_v26 = vrot.slane %v227_v24, %v743_v23 }
 0x110   :  { %v249_v28 = vcombine.high %v227_v24, %v227_v24 }
 0x111   :  { %v260_v48 = vrot.slane %v241_v47, %v743_v23  ;;  %v251_v52 = vcombine.high %v241_v47, %v241_v47  ;;  %v248_v61 = vrot.slane %v220_v57, %v210_v43 }
 0x113   :  { %173 = vbcast.lane.b32.xlu1 %v171_v31, 256  ;;  %v268_v56 = vrot.slane %v251_v52, %v743_v23  ;;  %v276_v3 = vrot.slane %v248_v61, %v743_v23  ;;  %v252_v10 = vcombine.high %v248_v61, %v248_v61 }
 0x115   :  { %v284_v16 = vrot.slane %v252_v10, %v743_v23 }
 0x117   :  { %180 = vbcast.lane.b32.xlu1 %v178_v33, 256 }
 0x11b   :  { %187 = vbcast.lane.b32.xlu1 %v185_v35, 256  ;;  %v264_v35 = vrot.slane %v249_v28, %v743_v23 }
 0x11f   :  { %194 = vbcast.lane.b32.xlu1 %v192_v37, 256  ;;  %v234_v37 = vrot.slane %v218_v53, %v210_v43 }
 0x121   :  { %v272_v41 = vrot.slane %v234_v37, %v743_v23  ;;  %v250_v42 = vcombine.high %v234_v37, %v234_v37 }
 0x123   :  { %201 = vbcast.lane.b32.xlu1 %v199_v39, 256  ;;  %v280_v45 = vrot.slane %v250_v42, %v743_v23 }
 0x17d   :  { %v160_v50 = vpop.permute.xlu1 %159  ;;  %v153_v1 = vpop.permute.xlu0 %152 }
 0x17e   :  { %v294_v51 = vsub.f32 %v160_v50, %v260_v48  ;;  %v293_v31 = vsub.f32 %v153_v1, %v256_v26 }
 0x180   :  { %621 = vtanh.f32 %v294_v51 }
 0x181   :  { %v167_v55 = vpop.permute.xlu1 %166 }
 0x182   :  { %v295_v40 = vsub.f32 %v167_v55, %v264_v35 }
 0x185   :  { %v174_v58 = vpop.permute.xlu1 %173 }
 0x186   :  { %v296_v59 = vsub.f32 %v174_v58, %v268_v56 }
 0x188   :  { %623 = vtanh.f32 %v296_v59 }
 0x189   :  { %v181_v62 = vpop.permute.xlu1 %180 }
 0x18a   :  { %v622_v63 = vpop.eup %621  ;;  %v297_v44 = vsub.f32 %v181_v62, %v272_v41 }
 0x18b   :  { %v319_v2 = vmul.f32 %v622_v63, %v776_v60 }
 0x18d   :  { %v188_v5 = vpop.permute.xlu1 %187  ;;  %v320_v6 = vsel %vm138_vm5, %v319_v2, 0.0 }
 0x18e   :  { %v298_v7 = vsub.f32 %v188_v5, %v276_v3  ;;  %v380_v8 = vpop.permute.xlu0 %379  ;;  %321 = vadd.xlane.f32.xlu0 %v320_v6 }
 0x18f   :  { %vm385_vm7 = vcmp.eq.s32.totalorder %v380_v8, %v603_v4 }
 0x190   :  { %625 = vtanh.f32 %v298_v7  ;;  %v386_v9 = vsel %vm385_vm7, 1.0, %v678_v0 }
 0x191   :  { %v786_v11 = vmul.f32 %v776_v60, %v386_v9  ;;  %v195_v12 = vpop.permute.xlu1 %194 }
 0x192   :  { %v624_v13 = vpop.eup %623  ;;  %v299_v46 = vsub.f32 %v195_v12, %v280_v45 }
 0x193   :  { %v432_v14 = vrot.slane %v786_v11, %v743_v23  ;;  %v327_v15 = vmul.f32 %v624_v13, %v776_v60  ;;  %v439_v52 = vrot.slane %v786_v11, %v156_v22  ;;  %v460_v56 = vrot.slane %v786_v11, %v177_v32 }
 0x194   :  { %v474_v22 = vrot.slane %v786_v11, %v191_v36  ;;  %v446_v61 = vrot.slane %v786_v11, %v163_v27  ;;  %v453_v32 = vrot.slane %v786_v11, %v170_v30  ;;  %v481_v36 = vrot.slane %v786_v11, %v198_v38 }
 0x195   :  { %v202_v17 = vpop.permute.xlu1 %201  ;;  %434 = vbcast.lane.b32.xlu1 %v432_v14, 256  ;;  %v328_v18 = vsel %vm138_vm5, %v327_v15, 0.0 }
 0x196   :  { %v300_v19 = vsub.f32 %v202_v17, %v284_v16  ;;  %329 = vadd.xlane.f32.xlu0 %v328_v18 }
 0x198   :  { %627 = vtanh.f32 %v300_v19 }
 0x199   :  { %629 = vtanh.f32 %v293_v31 }
 0x19a   :  { %v626_v0 = vpop.eup %625  ;;  %631 = vtanh.f32 %v295_v40 }
 0x19b   :  { %v335_v20 = vmul.f32 %v626_v0, %v776_v60  ;;  %633 = vtanh.f32 %v297_v44 }
 0x19c   :  { %635 = vtanh.f32 %v299_v46 }
 0x19d   :  { %v336_v25 = vsel %vm138_vm5, %v335_v20, 0.0 }
 0x19e   :  { %337 = vadd.xlane.f32.xlu0 %v336_v25 }
 0x1a2   :  { %v628_v29 = vpop.eup %627 }
 0x1a3   :  { %v343_v33 = vmul.f32 %v628_v29, %v776_v60  ;;  %v630_v47 = vpop.eup %629 }
 0x1a4   :  { %v314_v48 = vmul.f32 %v630_v47, %v776_v60  ;;  %v632_v49 = vpop.eup %631 }
 0x1a5   :  { %v344_v39 = vsel %vm138_vm5, %v343_v33, 0.0  ;;  %v323_v50 = vmul.f32 %v632_v49, %v776_v60  ;;  %v634_v51 = vpop.eup %633 }
 0x1a6   :  { %345 = vadd.xlane.f32.xlu0 %v344_v39  ;;  %v316_v43 = vsel %vm138_vm5, %v314_v48, 0.0  ;;  %v331_v53 = vmul.f32 %v634_v51, %v776_v60  ;;  %v636_v55 = vpop.eup %635 }
 0x1a7   :  { %v324_v23 = vsel %vm138_vm5, %v323_v50, 0.0  ;;  %v339_v58 = vmul.f32 %v636_v55, %v776_v60  ;;  %v467_v60 = vrot.slane %v786_v11, %v184_v34 }
 0x1a8   :  { %v332_v57 = vsel %vm138_vm5, %v331_v53, 0.0 }
 0x1a9   :  { %v340_v59 = vsel %vm138_vm5, %v339_v58, 0.0 }
 0x1b9   :  { %317 = vadd.xlane.f32.xlu1 %v316_v43 }
 0x1bc   :  { %441 = vbcast.lane.b32.xlu0 %v439_v52, 256 }
 0x1bd   :  { %325 = vadd.xlane.f32.xlu1 %v324_v23 }
 0x1c0   :  { %462 = vbcast.lane.b32.xlu0 %v460_v56, 256 }
 0x1c1   :  { %333 = vadd.xlane.f32.xlu1 %v332_v57 }
 0x1c4   :  { %476 = vbcast.lane.b32.xlu0 %v474_v22, 256 }
 0x1c5   :  { %341 = vadd.xlane.f32.xlu1 %v340_v59 }
 0x1d6   :  { %448 = vbcast.lane.b32.xlu1 %v446_v61, 256 }
 0x1da   :  { %455 = vbcast.lane.b32.xlu1 %v453_v32, 256 }
 0x1de   :  { %469 = vbcast.lane.b32.xlu1 %v467_v60, 256 }
 0x1e2   :  { %483 = vbcast.lane.b32.xlu1 %v481_v36, 256 }
 0x207   :  { %v435_v14 = vpop.permute.xlu1 %434 }
 0x21b   :  { %v322_v62 = vpop.xlane.xlu0 %321 }
 0x21c   :  { %v356_v63 = vadd.f32 8.0, %v322_v62 }
 0x21e   :  { %v364_v1 = vmul.f32 0.5, %v356_v63 }
 0x220   :  { %v389_v27 = vsub.f32 4.0, %v364_v1 }
 0x222   :  { %v397_v2 = vmul.f32 0.5, %v389_v27 }
 0x223   :  { %v330_v3 = vpop.xlane.xlu0 %329 }
 0x224   :  { %637 = vtanh.f32 %v397_v2  ;;  %v358_v34 = vadd.f32 8.0, %v330_v3 }
 0x226   :  { %v366_v10 = vmul.f32 0.5, %v358_v34 }
 0x228   :  { %v391_v38 = vsub.f32 4.0, %v366_v10 }
 0x22a   :  { %v399_v15 = vmul.f32 0.5, %v391_v38 }
 0x22b   :  { %v338_v30 = vpop.xlane.xlu0 %337 }
 0x22c   :  { %v360_v12 = vadd.f32 8.0, %v338_v30  ;;  %639 = vtanh.f32 %v399_v15  ;;  %v536_v15 = vsub.s32 %v771_v54, %v737_v21 }
 0x22e   :  { %v638_v4 = vpop.eup %637  ;;  %v368_v11 = vmul.f32 0.5, %v360_v12 }
 0x22f   :  { %v413_v5 = vmul.f32 0.5, %v638_v4 }
 0x230   :  { %v393_v16 = vsub.f32 4.0, %v368_v11 }
 0x231   :  { %v421_v7 = vadd.f32 0.5, %v413_v5 }
 0x232   :  { %v401_v0 = vmul.f32 0.5, %v393_v16 }
 0x233   :  { %v346_v6 = vpop.xlane.xlu0 %345 }
 0x234   :  { %v362_v13 = vadd.f32 8.0, %v346_v6  ;;  %641 = vtanh.f32 %v401_v0 }
 0x236   :  { %v370_v17 = vmul.f32 0.5, %v362_v13  ;;  %v640_v42 = vpop.eup %639 }
 0x237   :  { %v442_v8 = vpop.permute.xlu0 %441  ;;  %v415_v49 = vmul.f32 0.5, %v640_v42 }
 0x238   :  { %v494_v9 = vmul.f32 %v442_v8, %v421_v7  ;;  %v395_v20 = vsub.f32 4.0, %v370_v17 }
 0x239   :  { %v423_v53 = vadd.f32 0.5, %v415_v49 }
 0x23a   :  { %514 = vperm.xlu1 %617, %v494_v9   ;;  %v403_v29 = vmul.f32 0.5, %v395_v20 }
 0x23b   :  { %v463_v6 = vpop.permute.xlu0 %462 }
 0x23e   :  { %v642_v43 = vpop.eup %641 }
 0x23f   :  { %v417_v55 = vmul.f32 0.5, %v642_v43  ;;  %v477_v38 = vpop.permute.xlu0 %476 }
 0x241   :  { %v425_v32 = vadd.f32 0.5, %v417_v55 }
 0x246   :  { %v318_v18 = vpop.xlane.xlu1 %317 }
 0x247   :  { %v355_v19 = vadd.f32 8.0, %v318_v18 }
 0x249   :  { %v363_v24 = vmul.f32 0.5, %v355_v19 }
 0x24a   :  { %v326_v25 = vpop.xlane.xlu1 %325 }
 0x24b   :  { %v388_v26 = vsub.f32 4.0, %v363_v24  ;;  %v357_v28 = vadd.f32 8.0, %v326_v25 }
 0x24d   :  { %v396_v31 = vmul.f32 0.5, %v388_v26  ;;  %v365_v33 = vmul.f32 0.5, %v357_v28 }
 0x24e   :  { %v334_v35 = vpop.xlane.xlu1 %333 }
 0x24f   :  { %643 = vtanh.f32 %v396_v31  ;;  %v390_v37 = vsub.f32 4.0, %v365_v33  ;;  %v359_v39 = vadd.f32 8.0, %v334_v35 }
 0x250   :  { %645 = vtanh.f32 %v403_v29 }
 0x251   :  { %v398_v40 = vmul.f32 0.5, %v390_v37  ;;  %v367_v41 = vmul.f32 0.5, %v359_v39 }
 0x252   :  { %v342_v44 = vpop.xlane.xlu1 %341 }
 0x253   :  { %647 = vtanh.f32 %v398_v40  ;;  %v392_v45 = vsub.f32 4.0, %v367_v41  ;;  %v361_v46 = vadd.f32 8.0, %v342_v44 }
 0x255   :  { %v400_v47 = vmul.f32 0.5, %v392_v45  ;;  %v369_v48 = vmul.f32 0.5, %v361_v46  ;;  %v501_v45 = vld [vmem:[%s852_s5] sm:$0xff] }
 0x256   :  { %v449_v50 = vpop.permute.xlu1 %448 }
 0x257   :  { %649 = vtanh.f32 %v400_v47  ;;  %v394_v51 = vsub.f32 4.0, %v369_v48 }
 0x259   :  { %v644_v52 = vpop.eup %643  ;;  %v402_v23 = vmul.f32 0.5, %v394_v51 }
 0x25a   :  { %v646_v56 = vpop.eup %645  ;;  %v412_v57 = vmul.f32 0.5, %v644_v52  ;;  %v456_v58 = vpop.permute.xlu1 %455 }
 0x25b   :  { %651 = vtanh.f32 %v402_v23  ;;  %v496_v22 = vmul.f32 %v456_v58, %v423_v53  ;;  %v419_v60 = vmul.f32 0.5, %v646_v56 }
 0x25c   :  { %v420_v59 = vadd.f32 0.5, %v412_v57 }
 0x25d   :  { %v648_v61 = vpop.eup %647  ;;  %520 = vperm.xlu1 %617, %v496_v22   ;;  %v427_v3 = vadd.f32 0.5, %v419_v60 }
 0x25e   :  { %v414_v36 = vmul.f32 0.5, %v648_v61  ;;  %v470_v62 = vpop.permute.xlu1 %469  ;;  %v493_v63 = vmul.f32 %v435_v14, %v420_v59 }
 0x25f   :  { %v498_v1 = vmul.f32 %v470_v62, %v425_v32 }
 0x260   :  { %v422_v27 = vadd.f32 0.5, %v414_v36  ;;  %511 = vperm.xlu0 %616, %v493_v63  }
 0x261   :  { %v650_v2 = vpop.eup %649  ;;  %526 = vperm.xlu1 %617, %v498_v1  }
 0x262   :  { %v416_v4 = vmul.f32 0.5, %v650_v2  ;;  %v495_v30 = vmul.f32 %v449_v50, %v422_v27  ;;  %v484_v5 = vpop.permute.xlu1 %483 }
 0x263   :  { %v500_v7 = vmul.f32 %v484_v5, %v427_v3 }
 0x264   :  { %v424_v8 = vadd.f32 0.5, %v416_v4  ;;  %517 = vperm.xlu0 %616, %v495_v30  }
 0x265   :  { %v652_v34 = vpop.eup %651  ;;  %532 = vperm.xlu1 %617, %v500_v7  }
 0x266   :  { %v418_v9 = vmul.f32 0.5, %v652_v34  ;;  %v497_v10 = vmul.f32 %v463_v6, %v424_v8 }
 0x268   :  { %v426_v12 = vadd.f32 0.5, %v418_v9  ;;  %523 = vperm.xlu0 %616, %v497_v10  }
 0x26a   :  { %v499_v11 = vmul.f32 %v477_v38, %v426_v12 }
 0x26c   :  { %529 = vperm.xlu0 %616, %v499_v11  }
 0x2b9   :  { %v515_v13 = vpop.permute.xlu1 %514 }
 0x2ba   :  { %v541_v18 = vrot.slane %v515_v13, %v536_v15 }
 0x2dc   :  { %v521_v14 = vpop.permute.xlu1 %520 }
 0x2dd   :  { %v549_v26 = vrot.slane %v521_v14, %v536_v15 }
 0x2df   :  { %v512_v16 = vpop.permute.xlu0 %511 }
 0x2e0   :  { %v537_v17 = vrot.slane %v512_v16, %v536_v15  ;;  %v527_v0 = vpop.permute.xlu1 %526 }
 0x2e1   :  { %v557_v21 = vrot.slane %v527_v0, %v536_v15 }
 0x2e2   :  { %v567_v24 = vsel %vm566_vm8, %v541_v18, %v537_v17 }
 0x2e3   :  { %v518_v19 = vpop.permute.xlu0 %517 }
 0x2e4   :  { %v545_v20 = vrot.slane %v518_v19, %v536_v15  ;;  %v533_v33 = vpop.permute.xlu1 %532 }
 0x2e5   :  { %v565_v39 = vrot.slane %v533_v33, %v536_v15 }
 0x2e6   :  { %v569_v25 = vsel %vm568_vm9, %v545_v20, %v567_v24 }
 0x2e7   :  { %v524_v28 = vpop.permute.xlu0 %523  ;;  %v571_v31 = vsel %vm570_vm10, %v549_v26, %v569_v25 }
 0x2e8   :  { %v553_v29 = vrot.slane %v524_v28, %v536_v15 }
 0x2ea   :  { %v573_v35 = vsel %vm572_vm11, %v553_v29, %v571_v31 }
 0x2eb   :  { %v530_v54 = vpop.permute.xlu0 %529  ;;  %v575_v40 = vsel %vm574_vm12, %v557_v21, %v573_v35 }
 0x2ec   :  { %v561_v37 = vrot.slane %v530_v54, %v536_v15 }
 0x2ee   :  { %v577_v41 = vsel %vm576_vm13, %v561_v37, %v575_v40 }
 0x2ef   :  { %v579_v42 = vsel %vm578_vm14, %v565_v39, %v577_v41 }
 0x2f0   :  { %v581_v44 = vsel %vm138_vm5, %v579_v42, 0.0 }
 0x2f1   :  { %582 = vadd.xlane.f32.xlu0 %v581_v44 }
 0x37e   :  { %v583_v46 = vpop.xlane.xlu0 %582 }
 0x37f   :  { %v584_v47 = vadd.f32 %v583_v46, %v501_v45 }
 0x381   :  { %586 = vst.msk [vmem:[%s852_s5] sm:$0xff] %vm141_vm0, %v584_v47 }
 0x388   :  { %v590_v48 = vld [vmem:[%s852_s5] sm:$0xff] }
 0x389   :  { %v591_v49 = vmul.f32 0.25, %v590_v48 }
 0x38b   :  { %592 = vst.msk [vmem:[%s852_s5] sm:$0xff] %vm141_vm0, %v591_v49 }
 0x38c   :  { %597 = vsyncpa [#allocation5], 1 }

</bundles_post_ra>
